<compile_context>
chip_gen: v7x
topology: tpu7x:2x2x1
jax: 0.10.0
libtpu: 0.0.40
codegen_flags: <defaults>
</compile_context>

<pallas_src>
import jax
import jax.numpy as jnp
import numpy as np
from jax.experimental import pallas as pl
from jax.experimental.pallas import tpu as pltpu

# ---------------- problem sizes (small, consistent with the module) -----------
L = 8             # sequence length (context_length)
N = 2             # batch
D = 32            # d_model / transformer width
H = 4             # n_head
HD = D // H       # head dim
DFF = 4 * D       # MLP hidden
R = L * N         # fused rows per kernel invocation (row r = token r//N of batch r%N)
NUM_LAYERS = 4    # transformer.layers
EPS = 1e-5
NEG_INF = -1e9    # large-negative additive mask (== -inf masking after f32 softmax)
LOG2_N = N.bit_length() - 1
assert N == (1 << LOG2_N), "in-kernel mask generation assumes batch is a power of 2"


def _layer_norm(x, g, b):
    # x: (R, D), g/b: (1, D) -> fp32 layernorm over last dim
    mu = jnp.mean(x, axis=-1, keepdims=True)
    var = jnp.mean((x - mu) ** 2, axis=-1, keepdims=True)
    return (x - mu) * jax.lax.rsqrt(var + EPS) * g + b


def clip_text_transformer_kernel(
    x_ref,       # (R, D)        input activations (fetched once; constant block index)
    qkvo_ref,    # (D, 4D)=(32,128)  [wqkv_t | wo_t], q columns pre-scaled by 1/sqrt(HD)
    wfc_ref,     # (D, DFF)=(32,128)
    wproj_ref,   # (DFF, D)=(128,32)
    bvec_ref,    # (8, 128)      packed LN gains/biases + linear biases (see prep)
    o_ref,       # (R, D)        running activation; VMEM-resident across the layer grid
):
    layer = pl.program_id(0)

    @pl.when(layer == 0)
    def _():
        o_ref[...] = x_ref[...]

    x = o_ref[...]                                       # (R, D) fp32, previous layer's output

    # ---- unpack the packed bias/gain slab (one lane-dense vreg) ------------------
    bv = bvec_ref[...]                                   # (8, 128)
    ln1_g = bv[0:1, 0 * D:1 * D]
    ln1_b = bv[0:1, 1 * D:2 * D]
    bo    = bv[0:1, 2 * D:3 * D]
    ln2_g = bv[0:1, 3 * D:4 * D]
    ln2_b = bv[1:2, 0 * D:1 * D]
    bproj = bv[1:2, 1 * D:2 * D]
    bqkv  = bv[2:3, 0:3 * D]                             # q part pre-scaled
    bfc   = bv[3:4, :]                                   # (1, DFF)

    wqkv_t = qkvo_ref[:, 0:3 * D]                        # (D, 3D)
    wo_t   = qkvo_ref[:, 3 * D:4 * D]                    # (D, D)

    # ---- additive score bias: cross-batch blocking + CLIP causal mask, in-register
    ri = jax.lax.broadcasted_iota(jnp.int32, (R, R), 0)
    rj = jax.lax.broadcasted_iota(jnp.int32, (R, R), 1)
    same_batch = (ri & (N - 1)) == (rj & (N - 1))        # n_i == n_j
    causal = (ri >> LOG2_N) >= (rj >> LOG2_N)            # l_i >= l_j  (CLIP build_attention_mask)
    score_bias = jnp.where(same_batch & causal, 0.0, NEG_INF).astype(jnp.float32)

    # ---- x = x + MHA(LN1(x)) ------------------------------------------------------
    xn = _layer_norm(x, ln1_g, ln1_b)
    qkv = jnp.dot(xn, wqkv_t, preferred_element_type=jnp.float32) + bqkv      # (R, 3D)

    attn = jnp.zeros((R, D), jnp.float32)
    for h in range(H):   # static unroll; per-head Wo accumulation (no lane concat)
        qh = qkv[:, h * HD:(h + 1) * HD]                 # (R, HD), scale folded in
        kh = qkv[:, D + h * HD:D + (h + 1) * HD]
        vh = qkv[:, 2 * D + h * HD:2 * D + (h + 1) * HD]
        s = jax.lax.dot_general(qh, kh, (((1,), (1,)), ((), ())),
                                preferred_element_type=jnp.float32) + score_bias
        s = s - jnp.max(s, axis=-1, keepdims=True)
        p = jnp.exp(s)
        p = p * pl.reciprocal(jnp.sum(p, axis=-1, keepdims=True), approx=True)
        oh = jnp.dot(p, vh, preferred_element_type=jnp.float32)               # (R, HD)
        attn = attn + jnp.dot(oh, wo_t[h * HD:(h + 1) * HD, :],
                              preferred_element_type=jnp.float32)
    x1 = x + attn + bo

    # ---- x = x + MLP(LN2(x)) ------------------------------------------------------
    xn2 = _layer_norm(x1, ln2_g, ln2_b)
    hdn = jnp.dot(xn2, wfc_ref[...], preferred_element_type=jnp.float32) + bfc  # (R, DFF)
    hdn = hdn * jax.nn.sigmoid(1.702 * hdn)              # QuickGELU
    mlp = jnp.dot(hdn, wproj_ref[...], preferred_element_type=jnp.float32) + bproj
    o_ref[...] = x1 + mlp


@jax.jit
def clip_text_transformer(x_lnd, kp):
    """x_lnd: (L, N, D) fp32 -> (L, N, D) fp32 after all NUM_LAYERS resblocks."""
    x2 = x_lnd.reshape(R, D)                             # contiguous (L,N)->(L*N) merge: free
    num_layers = kp["qkvo"].shape[0]
    out = pl.pallas_call(
        clip_text_transformer_kernel,
        out_shape=jax.ShapeDtypeStruct((R, D), jnp.float32),
        grid=(num_layers,),
        in_specs=[
            pl.BlockSpec((R, D), lambda l: (0, 0)),            # x: fetched once
            pl.BlockSpec((None, D, 4 * D), lambda l: (l, 0, 0)),
            pl.BlockSpec((None, D, DFF), lambda l: (l, 0, 0)),
            pl.BlockSpec((None, DFF, D), lambda l: (l, 0, 0)),
            pl.BlockSpec((None, 8, 128), lambda l: (l, 0, 0)),
        ],
        out_specs=pl.BlockSpec((R, D), lambda l: (0, 0)),      # resident across layers
        compiler_params=pltpu.CompilerParams(
            dimension_semantics=("arbitrary",)),
    )(x2, kp["qkvo"], kp["wfc"], kp["wproj"], kp["bvec"])
    return out.reshape(L, N, D)                          # free reshape back


# ------------------- parameter / mask preparation (load-time) -----------------
def build_causal_mask(context_length):
    """CLIP.build_attention_mask equivalent (large-negative instead of -inf)."""
    m = np.full((context_length, context_length), NEG_INF, np.float32)
    return np.triu(m, 1)


def prepare_kernel_params(layer_params):
    """Pack canonical per-layer params into 4 stacked kernel slabs per layer and fold
       the 1/sqrt(HD) attention scale into the q columns of the in-projection."""
    scale = 1.0 / float(np.sqrt(HD))
    qkvo, wfc, wproj, bvec = [], [], [], []
    for p in layer_params:
        wqkv_t = np.asarray(p["wqkv_t"])
        wqkv_t = np.concatenate([wqkv_t[:, :D] * scale, wqkv_t[:, D:]], axis=1)
        qkvo.append(np.concatenate([wqkv_t, np.asarray(p["wo_t"])], axis=1))   # (D, 4D)
        wfc.append(np.asarray(p["wfc_t"]))                                     # (D, DFF)
        wproj.append(np.asarray(p["wproj_t"]))                                 # (DFF, D)

        bqkv = np.asarray(p["bqkv"])[0]
        bqkv = np.concatenate([bqkv[:D] * scale, bqkv[D:]])
        slab = np.zeros((8, 128), np.float32)
        slab[0, 0 * D:1 * D] = np.asarray(p["ln1_g"])[0]
        slab[0, 1 * D:2 * D] = np.asarray(p["ln1_b"])[0]
        slab[0, 2 * D:3 * D] = np.asarray(p["bo"])[0]
        slab[0, 3 * D:4 * D] = np.asarray(p["ln2_g"])[0]
        slab[1, 0 * D:1 * D] = np.asarray(p["ln2_b"])[0]
        slab[1, 1 * D:2 * D] = np.asarray(p["bproj"])[0]
        slab[2, 0:3 * D] = bqkv
        slab[3, 0:DFF] = np.asarray(p["bfc"])[0]
        bvec.append(slab)
    return {
        "qkvo": jnp.asarray(np.stack(qkvo)),     # (NL, D, 4D)   lane-dense
        "wfc": jnp.asarray(np.stack(wfc)),       # (NL, D, DFF)  lane-dense
        "wproj": jnp.asarray(np.stack(wproj)),   # (NL, DFF, D)
        "bvec": jnp.asarray(np.stack(bvec)),     # (NL, 8, 128)  lane-dense
    }


def make_layer_params(key):
    ks = jax.random.split(key, 10)
    std = 0.05
    # PyTorch Linear stores W as (out, in); pre-transpose so the kernel does x @ W_t.
    wqkv = std * jax.random.normal(ks[0], (3 * D, D), jnp.float32)
    wo = std * jax.random.normal(ks[1], (D, D), jnp.float32)
    wfc = std * jax.random.normal(ks[2], (DFF, D), jnp.float32)
    wproj = std * jax.random.normal(ks[3], (D, DFF), jnp.float32)
    return {
        "ln1_g": 1.0 + 0.1 * jax.random.normal(ks[8], (1, D), jnp.float32),
        "ln1_b": 0.1 * jax.random.normal(ks[9], (1, D), jnp.float32),
        "wqkv_t": wqkv.T, "bqkv": std * jax.random.normal(ks[4], (1, 3 * D), jnp.float32),
        "wo_t": wo.T, "bo": std * jax.random.normal(ks[5], (1, D), jnp.float32),
        "ln2_g": jnp.ones((1, D), jnp.float32),
        "ln2_b": jnp.zeros((1, D), jnp.float32),
        "wfc_t": wfc.T, "bfc": std * jax.random.normal(ks[6], (1, DFF), jnp.float32),
        "wproj_t": wproj.T, "bproj": std * jax.random.normal(ks[7], (1, D), jnp.float32),
    }


def make_params(key, num_layers):
    return [make_layer_params(k) for k in jax.random.split(key, num_layers)]


# ------------------------- pure-JAX reference --------------------------------
def reference_block(x, p, attn_mask):
    """Canonical math on canonical (unscaled) params; x: (L, N, D)."""
    def ln(v, g, b):
        mu = v.mean(-1, keepdims=True)
        var = ((v - mu) ** 2).mean(-1, keepdims=True)
        return (v - mu) / jnp.sqrt(var + EPS) * g[0] + b[0]

    xn = ln(x, p["ln1_g"], p["ln1_b"])                   # (L, N, D)
    qkv = xn @ p["wqkv_t"] + p["bqkv"][0]                # (L, N, 3D)
    q, k, v = jnp.split(qkv, 3, axis=-1)
    q = q.reshape(L, N, H, HD)
    k = k.reshape(L, N, H, HD)
    v = v.reshape(L, N, H, HD)
    s = jnp.einsum("lnhd,mnhd->nhlm", q, k) / np.sqrt(HD)
    s = s + attn_mask[None, None, :, :]
    pw = jax.nn.softmax(s, axis=-1)
    a = jnp.einsum("nhlm,mnhd->lnhd", pw, v).reshape(L, N, D)
    a = a @ p["wo_t"] + p["bo"][0]
    x1 = x + a
    xn2 = ln(x1, p["ln2_g"], p["ln2_b"])
    hdn = xn2 @ p["wfc_t"] + p["bfc"][0]
    hdn = hdn * jax.nn.sigmoid(1.702 * hdn)
    return x1 + hdn @ p["wproj_t"] + p["bproj"][0]


def reference_forward(x, layer_params, attn_mask):
    for p in layer_params:
        x = reference_block(x, p, attn_mask)
    return x


if __name__ == "__main__":
    key = jax.random.PRNGKey(0)
    k_x, k_p = jax.random.split(key)
    x = jax.random.normal(k_x, (L, N, D), jnp.float32)    # (seq, batch, d_model)
    layer_params = make_params(k_p, NUM_LAYERS)
    kparams = prepare_kernel_params(layer_params)

    out = jax.block_until_ready(clip_text_transformer(x, kparams))

    ref = reference_forward(x, layer_params, jnp.asarray(build_causal_mask(L)))
    # Tolerance accommodates the EUP approximate reciprocal in each layer's softmax
    # (per perf review: fine for inference; use exact division if adding a VJP).
    np.testing.assert_allclose(np.asarray(out), np.asarray(ref), atol=2e-3, rtol=2e-3)
    print("KERNEL_OK")
</pallas_src>

<mosaic_0001>
module attributes {stable_mosaic.version = 11 : i64} {
  func.func @clip_text_transformer_kernel(%arg0: i32, %arg1: memref<16x32xf32, #tpu.memory_space<vmem>>, %arg2: memref<1x32x128xf32, #tpu.memory_space<vmem>>, %arg3: memref<1x32x128xf32, #tpu.memory_space<vmem>>, %arg4: memref<1x128x32xf32, #tpu.memory_space<vmem>>, %arg5: memref<1x8x128xf32, #tpu.memory_space<vmem>>, %arg6: memref<16x32xf32, #tpu.memory_space<vmem>>) attributes {dimension_semantics = [#tpu.dimension_semantics<arbitrary>], iteration_bounds = array<i64: 4>, scalar_prefetch = 0 : i64, scratch_operands = 0 : i64, tpu.core_type = #tpu.core_type<tc>, window_params = [{pipeline_mode = #tpu.pipeline_mode<synchronous>, transform_indices = @transform_0, window_bounds = array<i64: 16, 32>}, {transform_indices = @transform_1, window_bounds = array<i64: 1, 32, 128>}, {transform_indices = @transform_2, window_bounds = array<i64: 1, 32, 128>}, {transform_indices = @transform_3, window_bounds = array<i64: 1, 128, 32>}, {transform_indices = @transform_4, window_bounds = array<i64: 1, 8, 128>}, {pipeline_mode = #tpu.pipeline_mode<synchronous>, transform_indices = @transform_5, window_bounds = array<i64: 16, 32>}]} {
    %c0_i32 = arith.constant 0 : i32
    %0 = arith.cmpi eq, %arg0, %c0_i32 : i32
    %1 = arith.extui %0 : i1 to i32
    %c0_i32_0 = arith.constant 0 : i32
    %2 = arith.cmpi ne, %1, %c0_i32_0 : i32
    scf.if %2 {
      %c0_58 = arith.constant 0 : index
      %c0_59 = arith.constant 0 : index
      %181 = vector.load %arg1[%c0_58, %c0_59] : memref<16x32xf32, #tpu.memory_space<vmem>>, vector<16x32xf32>
      %c0_60 = arith.constant 0 : index
      %c0_61 = arith.constant 0 : index
      %182 = vector.load %arg6[%c0_60, %c0_61] : memref<16x32xf32, #tpu.memory_space<vmem>>, vector<16x32xf32>
      tpu.vector_store %arg6[%c0_60, %c0_61], %181 {strides = array<i32>} : memref<16x32xf32, #tpu.memory_space<vmem>>, vector<16x32xf32>,
    } else {
    }
    %c0 = arith.constant 0 : index
    %c0_1 = arith.constant 0 : index
    %3 = vector.load %arg6[%c0, %c0_1] : memref<16x32xf32, #tpu.memory_space<vmem>>, vector<16x32xf32>
    %c0_2 = arith.constant 0 : index
    %c0_3 = arith.constant 0 : index
    %c0_4 = arith.constant 0 : index
    %4 = vector.load %arg5[%c0_2, %c0_3, %c0_4] : memref<1x8x128xf32, #tpu.memory_space<vmem>>, vector<1x8x128xf32>
    %5 = vector.shape_cast %4 : vector<1x8x128xf32> to vector<8x128xf32>
    %6 = vector.extract_strided_slice %5 {offsets = [0, 0], sizes = [1, 32], strides = [1, 1]} : vector<8x128xf32> to vector<1x32xf32>
    %7 = vector.extract_strided_slice %5 {offsets = [0, 32], sizes = [1, 32], strides = [1, 1]} : vector<8x128xf32> to vector<1x32xf32>
    %8 = vector.extract_strided_slice %5 {offsets = [0, 64], sizes = [1, 32], strides = [1, 1]} : vector<8x128xf32> to vector<1x32xf32>
    %9 = vector.extract_strided_slice %5 {offsets = [0, 96], sizes = [1, 32], strides = [1, 1]} : vector<8x128xf32> to vector<1x32xf32>
    %10 = vector.extract_strided_slice %5 {offsets = [1, 0], sizes = [1, 32], strides = [1, 1]} : vector<8x128xf32> to vector<1x32xf32>
    %11 = vector.extract_strided_slice %5 {offsets = [1, 32], sizes = [1, 32], strides = [1, 1]} : vector<8x128xf32> to vector<1x32xf32>
    %12 = vector.extract_strided_slice %5 {offsets = [2, 0], sizes = [1, 96], strides = [1, 1]} : vector<8x128xf32> to vector<1x96xf32>
    %13 = vector.extract_strided_slice %5 {offsets = [3, 0], sizes = [1, 128], strides = [1, 1]} : vector<8x128xf32> to vector<1x128xf32>
    %c0_5 = arith.constant 0 : index
    %c0_6 = arith.constant 0 : index
    %c0_7 = arith.constant 0 : index
    %14 = vector.load %arg2[%c0_5, %c0_6, %c0_7] : memref<1x32x128xf32, #tpu.memory_space<vmem>>, vector<1x32x96xf32>
    %15 = vector.shape_cast %14 : vector<1x32x96xf32> to vector<32x96xf32>
    %c0_8 = arith.constant 0 : index
    %c0_9 = arith.constant 0 : index
    %c96 = arith.constant 96 : index
    %16 = vector.load %arg2[%c0_8, %c0_9, %c96] : memref<1x32x128xf32, #tpu.memory_space<vmem>>, vector<1x32x32xf32>
    %17 = vector.shape_cast %16 : vector<1x32x32xf32> to vector<32x32xf32>
    %18 = tpu.iota {dimensions = array<i32: 0>} : vector<16x16xi32>
    %19 = tpu.iota {dimensions = array<i32: 1>} : vector<16x16xi32>
    %c1_i32 = arith.constant 1 : i32
    %20 = vector.broadcast %c1_i32 : i32 to vector<16x16xi32>
    %21 = arith.andi %18, %20 : vector<16x16xi32>
    %c1_i32_10 = arith.constant 1 : i32
    %22 = vector.broadcast %c1_i32_10 : i32 to vector<16x16xi32>
    %23 = arith.andi %19, %22 : vector<16x16xi32>
    %24 = arith.cmpi eq, %21, %23 : vector<16x16xi32>
    %c1_i32_11 = arith.constant 1 : i32
    %25 = vector.broadcast %c1_i32_11 : i32 to vector<16x16xi32>
    %26 = arith.shrsi %18, %25 : vector<16x16xi32>
    %c1_i32_12 = arith.constant 1 : i32
    %27 = vector.broadcast %c1_i32_12 : i32 to vector<16x16xi32>
    %28 = arith.shrsi %19, %27 : vector<16x16xi32>
    %29 = arith.cmpi sge, %26, %28 : vector<16x16xi32>
    %30 = arith.andi %24, %29 : vector<16x16xi1>
    %cst = arith.constant 0.000000e+00 : f32
    %cst_13 = arith.constant -1.000000e+09 : f32
    %31 = vector.broadcast %cst : f32 to vector<16x16xf32>
    %32 = vector.broadcast %cst_13 : f32 to vector<16x16xf32>
    %33 = arith.select %30, %31, %32 : vector<16x16xi1>, vector<16x16xf32>
    %cst_14 = arith.constant dense<0.000000e+00> : vector<16xf32>
    %34 = vector.multi_reduction <add>, %3, %cst_14 [1] : vector<16x32xf32> to vector<16xf32>
    %35 = vector.shape_cast %34 : vector<16xf32> to vector<16x1xf32>
    %cst_15 = arith.constant 3.200000e+01 : f32
    %36 = vector.broadcast %cst_15 : f32 to vector<16x1xf32>
    %37 = arith.divf %35, %36 : vector<16x1xf32>
    %38 = vector.broadcast %37 : vector<16x1xf32> to vector<16x32xf32>
    %39 = arith.subf %3, %38 : vector<16x32xf32>
    %40 = arith.mulf %39, %39 : vector<16x32xf32>
    %cst_16 = arith.constant dense<0.000000e+00> : vector<16xf32>
    %41 = vector.multi_reduction <add>, %40, %cst_16 [1] : vector<16x32xf32> to vector<16xf32>
    %42 = vector.shape_cast %41 : vector<16xf32> to vector<16x1xf32>
    %cst_17 = arith.constant 3.200000e+01 : f32
    %43 = vector.broadcast %cst_17 : f32 to vector<16x1xf32>
    %44 = arith.divf %42, %43 : vector<16x1xf32>
    %45 = vector.broadcast %37 : vector<16x1xf32> to vector<16x32xf32>
    %46 = arith.subf %3, %45 : vector<16x32xf32>
    %cst_18 = arith.constant 9.99999974E-6 : f32
    %47 = vector.broadcast %cst_18 : f32 to vector<16x1xf32>
    %48 = arith.addf %44, %47 : vector<16x1xf32>
    %49 = math.rsqrt %48 : vector<16x1xf32>
    %50 = vector.broadcast %49 : vector<16x1xf32> to vector<16x32xf32>
    %51 = arith.mulf %46, %50 : vector<16x32xf32>
    %52 = vector.broadcast %6 : vector<1x32xf32> to vector<16x32xf32>
    %53 = arith.mulf %51, %52 : vector<16x32xf32>
    %54 = vector.broadcast %7 : vector<1x32xf32> to vector<16x32xf32>
    %55 = arith.addf %53, %54 : vector<16x32xf32>
    %cst_19 = arith.constant dense<0.000000e+00> : vector<16x96xf32>
    %56 = tpu.matmul %55, %15, %cst_19 {dimension_numbers = #tpu.dot_dimension_numbers<[1], [0], [0], [1], [0, 0, 1, 1], [], []>} : vector<16x32xf32>, vector<32x96xf32>, vector<16x96xf32> -> vector<16x96xf32>
    %57 = vector.broadcast %12 : vector<1x96xf32> to vector<16x96xf32>
    %58 = arith.addf %56, %57 : vector<16x96xf32>
    %cst_20 = arith.constant 0.000000e+00 : f32
    %59 = vector.broadcast %cst_20 : f32 to vector<16x32xf32>
    %60 = vector.extract_strided_slice %58 {offsets = [0, 0], sizes = [16, 8], strides = [1, 1]} : vector<16x96xf32> to vector<16x8xf32>
    %61 = vector.extract_strided_slice %58 {offsets = [0, 32], sizes = [16, 8], strides = [1, 1]} : vector<16x96xf32> to vector<16x8xf32>
    %62 = vector.extract_strided_slice %58 {offsets = [0, 64], sizes = [16, 8], strides = [1, 1]} : vector<16x96xf32> to vector<16x8xf32>
    %cst_21 = arith.constant dense<0.000000e+00> : vector<16x16xf32>
    %63 = tpu.matmul %60, %61, %cst_21 {dimension_numbers = #tpu.dot_dimension_numbers<[1], [1], [0], [0], [0, 0, 1, 0], [], []>} : vector<16x8xf32>, vector<16x8xf32>, vector<16x16xf32> -> vector<16x16xf32>
    %64 = arith.addf %63, %33 : vector<16x16xf32>
    %cst_22 = arith.constant dense<0xFF800000> : vector<16xf32>
    %65 = vector.multi_reduction <maximumf>, %64, %cst_22 [1] : vector<16x16xf32> to vector<16xf32>
    %66 = vector.shape_cast %65 : vector<16xf32> to vector<16x1xf32>
    %67 = vector.broadcast %66 : vector<16x1xf32> to vector<16x16xf32>
    %68 = arith.subf %64, %67 : vector<16x16xf32>
    %69 = math.exp %68 : vector<16x16xf32>
    %cst_23 = arith.constant dense<0.000000e+00> : vector<16xf32>
    %70 = vector.multi_reduction <add>, %69, %cst_23 [1] : vector<16x16xf32> to vector<16xf32>
    %71 = vector.shape_cast %70 : vector<16xf32> to vector<16x1xf32>
    %72 = tpu.reciprocal %71 {approx = true} : vector<16x1xf32> -> vector<16x1xf32>
    %73 = vector.broadcast %72 : vector<16x1xf32> to vector<16x16xf32>
    %74 = arith.mulf %69, %73 : vector<16x16xf32>
    %cst_24 = arith.constant dense<0.000000e+00> : vector<16x8xf32>
    %75 = tpu.matmul %74, %62, %cst_24 {dimension_numbers = #tpu.dot_dimension_numbers<[1], [0], [0], [1], [0, 0, 1, 1], [], []>} : vector<16x16xf32>, vector<16x8xf32>, vector<16x8xf32> -> vector<16x8xf32>
    %76 = vector.extract_strided_slice %17 {offsets = [0, 0], sizes = [8, 32], strides = [1, 1]} : vector<32x32xf32> to vector<8x32xf32>
    %cst_25 = arith.constant dense<0.000000e+00> : vector<16x32xf32>
    %77 = tpu.matmul %75, %76, %cst_25 {dimension_numbers = #tpu.dot_dimension_numbers<[1], [0], [0], [1], [0, 0, 1, 1], [], []>} : vector<16x8xf32>, vector<8x32xf32>, vector<16x32xf32> -> vector<16x32xf32>
    %78 = arith.addf %59, %77 : vector<16x32xf32>
    %79 = vector.extract_strided_slice %58 {offsets = [0, 8], sizes = [16, 8], strides = [1, 1]} : vector<16x96xf32> to vector<16x8xf32>
    %80 = vector.extract_strided_slice %58 {offsets = [0, 40], sizes = [16, 8], strides = [1, 1]} : vector<16x96xf32> to vector<16x8xf32>
    %81 = vector.extract_strided_slice %58 {offsets = [0, 72], sizes = [16, 8], strides = [1, 1]} : vector<16x96xf32> to vector<16x8xf32>
    %cst_26 = arith.constant dense<0.000000e+00> : vector<16x16xf32>
    %82 = tpu.matmul %79, %80, %cst_26 {dimension_numbers = #tpu.dot_dimension_numbers<[1], [1], [0], [0], [0, 0, 1, 0], [], []>} : vector<16x8xf32>, vector<16x8xf32>, vector<16x16xf32> -> vector<16x16xf32>
    %83 = arith.addf %82, %33 : vector<16x16xf32>
    %cst_27 = arith.constant dense<0xFF800000> : vector<16xf32>
    %84 = vector.multi_reduction <maximumf>, %83, %cst_27 [1] : vector<16x16xf32> to vector<16xf32>
    %85 = vector.shape_cast %84 : vector<16xf32> to vector<16x1xf32>
    %86 = vector.broadcast %85 : vector<16x1xf32> to vector<16x16xf32>
    %87 = arith.subf %83, %86 : vector<16x16xf32>
    %88 = math.exp %87 : vector<16x16xf32>
    %cst_28 = arith.constant dense<0.000000e+00> : vector<16xf32>
    %89 = vector.multi_reduction <add>, %88, %cst_28 [1] : vector<16x16xf32> to vector<16xf32>
    %90 = vector.shape_cast %89 : vector<16xf32> to vector<16x1xf32>
    %91 = tpu.reciprocal %90 {approx = true} : vector<16x1xf32> -> vector<16x1xf32>
    %92 = vector.broadcast %91 : vector<16x1xf32> to vector<16x16xf32>
    %93 = arith.mulf %88, %92 : vector<16x16xf32>
    %cst_29 = arith.constant dense<0.000000e+00> : vector<16x8xf32>
    %94 = tpu.matmul %93, %81, %cst_29 {dimension_numbers = #tpu.dot_dimension_numbers<[1], [0], [0], [1], [0, 0, 1, 1], [], []>} : vector<16x16xf32>, vector<16x8xf32>, vector<16x8xf32> -> vector<16x8xf32>
    %95 = vector.extract_strided_slice %17 {offsets = [8, 0], sizes = [8, 32], strides = [1, 1]} : vector<32x32xf32> to vector<8x32xf32>
    %cst_30 = arith.constant dense<0.000000e+00> : vector<16x32xf32>
    %96 = tpu.matmul %94, %95, %cst_30 {dimension_numbers = #tpu.dot_dimension_numbers<[1], [0], [0], [1], [0, 0, 1, 1], [], []>} : vector<16x8xf32>, vector<8x32xf32>, vector<16x32xf32> -> vector<16x32xf32>
    %97 = arith.addf %78, %96 : vector<16x32xf32>
    %98 = vector.extract_strided_slice %58 {offsets = [0, 16], sizes = [16, 8], strides = [1, 1]} : vector<16x96xf32> to vector<16x8xf32>
    %99 = vector.extract_strided_slice %58 {offsets = [0, 48], sizes = [16, 8], strides = [1, 1]} : vector<16x96xf32> to vector<16x8xf32>
    %100 = vector.extract_strided_slice %58 {offsets = [0, 80], sizes = [16, 8], strides = [1, 1]} : vector<16x96xf32> to vector<16x8xf32>
    %cst_31 = arith.constant dense<0.000000e+00> : vector<16x16xf32>
    %101 = tpu.matmul %98, %99, %cst_31 {dimension_numbers = #tpu.dot_dimension_numbers<[1], [1], [0], [0], [0, 0, 1, 0], [], []>} : vector<16x8xf32>, vector<16x8xf32>, vector<16x16xf32> -> vector<16x16xf32>
    %102 = arith.addf %101, %33 : vector<16x16xf32>
    %cst_32 = arith.constant dense<0xFF800000> : vector<16xf32>
    %103 = vector.multi_reduction <maximumf>, %102, %cst_32 [1] : vector<16x16xf32> to vector<16xf32>
    %104 = vector.shape_cast %103 : vector<16xf32> to vector<16x1xf32>
    %105 = vector.broadcast %104 : vector<16x1xf32> to vector<16x16xf32>
    %106 = arith.subf %102, %105 : vector<16x16xf32>
    %107 = math.exp %106 : vector<16x16xf32>
    %cst_33 = arith.constant dense<0.000000e+00> : vector<16xf32>
    %108 = vector.multi_reduction <add>, %107, %cst_33 [1] : vector<16x16xf32> to vector<16xf32>
    %109 = vector.shape_cast %108 : vector<16xf32> to vector<16x1xf32>
    %110 = tpu.reciprocal %109 {approx = true} : vector<16x1xf32> -> vector<16x1xf32>
    %111 = vector.broadcast %110 : vector<16x1xf32> to vector<16x16xf32>
    %112 = arith.mulf %107, %111 : vector<16x16xf32>
    %cst_34 = arith.constant dense<0.000000e+00> : vector<16x8xf32>
    %113 = tpu.matmul %112, %100, %cst_34 {dimension_numbers = #tpu.dot_dimension_numbers<[1], [0], [0], [1], [0, 0, 1, 1], [], []>} : vector<16x16xf32>, vector<16x8xf32>, vector<16x8xf32> -> vector<16x8xf32>
    %114 = vector.extract_strided_slice %17 {offsets = [16, 0], sizes = [8, 32], strides = [1, 1]} : vector<32x32xf32> to vector<8x32xf32>
    %cst_35 = arith.constant dense<0.000000e+00> : vector<16x32xf32>
    %115 = tpu.matmul %113, %114, %cst_35 {dimension_numbers = #tpu.dot_dimension_numbers<[1], [0], [0], [1], [0, 0, 1, 1], [], []>} : vector<16x8xf32>, vector<8x32xf32>, vector<16x32xf32> -> vector<16x32xf32>
    %116 = arith.addf %97, %115 : vector<16x32xf32>
    %117 = vector.extract_strided_slice %58 {offsets = [0, 24], sizes = [16, 8], strides = [1, 1]} : vector<16x96xf32> to vector<16x8xf32>
    %118 = vector.extract_strided_slice %58 {offsets = [0, 56], sizes = [16, 8], strides = [1, 1]} : vector<16x96xf32> to vector<16x8xf32>
    %119 = vector.extract_strided_slice %58 {offsets = [0, 88], sizes = [16, 8], strides = [1, 1]} : vector<16x96xf32> to vector<16x8xf32>
    %cst_36 = arith.constant dense<0.000000e+00> : vector<16x16xf32>
    %120 = tpu.matmul %117, %118, %cst_36 {dimension_numbers = #tpu.dot_dimension_numbers<[1], [1], [0], [0], [0, 0, 1, 0], [], []>} : vector<16x8xf32>, vector<16x8xf32>, vector<16x16xf32> -> vector<16x16xf32>
    %121 = arith.addf %120, %33 : vector<16x16xf32>
    %cst_37 = arith.constant dense<0xFF800000> : vector<16xf32>
    %122 = vector.multi_reduction <maximumf>, %121, %cst_37 [1] : vector<16x16xf32> to vector<16xf32>
    %123 = vector.shape_cast %122 : vector<16xf32> to vector<16x1xf32>
    %124 = vector.broadcast %123 : vector<16x1xf32> to vector<16x16xf32>
    %125 = arith.subf %121, %124 : vector<16x16xf32>
    %126 = math.exp %125 : vector<16x16xf32>
    %cst_38 = arith.constant dense<0.000000e+00> : vector<16xf32>
    %127 = vector.multi_reduction <add>, %126, %cst_38 [1] : vector<16x16xf32> to vector<16xf32>
    %128 = vector.shape_cast %127 : vector<16xf32> to vector<16x1xf32>
    %129 = tpu.reciprocal %128 {approx = true} : vector<16x1xf32> -> vector<16x1xf32>
    %130 = vector.broadcast %129 : vector<16x1xf32> to vector<16x16xf32>
    %131 = arith.mulf %126, %130 : vector<16x16xf32>
    %cst_39 = arith.constant dense<0.000000e+00> : vector<16x8xf32>
    %132 = tpu.matmul %131, %119, %cst_39 {dimension_numbers = #tpu.dot_dimension_numbers<[1], [0], [0], [1], [0, 0, 1, 1], [], []>} : vector<16x16xf32>, vector<16x8xf32>, vector<16x8xf32> -> vector<16x8xf32>
    %133 = vector.extract_strided_slice %17 {offsets = [24, 0], sizes = [8, 32], strides = [1, 1]} : vector<32x32xf32> to vector<8x32xf32>
    %cst_40 = arith.constant dense<0.000000e+00> : vector<16x32xf32>
    %134 = tpu.matmul %132, %133, %cst_40 {dimension_numbers = #tpu.dot_dimension_numbers<[1], [0], [0], [1], [0, 0, 1, 1], [], []>} : vector<16x8xf32>, vector<8x32xf32>, vector<16x32xf32> -> vector<16x32xf32>
    %135 = arith.addf %116, %134 : vector<16x32xf32>
    %136 = arith.addf %3, %135 : vector<16x32xf32>
    %137 = vector.broadcast %8 : vector<1x32xf32> to vector<16x32xf32>
    %138 = arith.addf %136, %137 : vector<16x32xf32>
    %cst_41 = arith.constant dense<0.000000e+00> : vector<16xf32>
    %139 = vector.multi_reduction <add>, %138, %cst_41 [1] : vector<16x32xf32> to vector<16xf32>
    %140 = vector.shape_cast %139 : vector<16xf32> to vector<16x1xf32>
    %cst_42 = arith.constant 3.200000e+01 : f32
    %141 = vector.broadcast %cst_42 : f32 to vector<16x1xf32>
    %142 = arith.divf %140, %141 : vector<16x1xf32>
    %143 = vector.broadcast %142 : vector<16x1xf32> to vector<16x32xf32>
    %144 = arith.subf %138, %143 : vector<16x32xf32>
    %145 = arith.mulf %144, %144 : vector<16x32xf32>
    %cst_43 = arith.constant dense<0.000000e+00> : vector<16xf32>
    %146 = vector.multi_reduction <add>, %145, %cst_43 [1] : vector<16x32xf32> to vector<16xf32>
    %147 = vector.shape_cast %146 : vector<16xf32> to vector<16x1xf32>
    %cst_44 = arith.constant 3.200000e+01 : f32
    %148 = vector.broadcast %cst_44 : f32 to vector<16x1xf32>
    %149 = arith.divf %147, %148 : vector<16x1xf32>
    %150 = vector.broadcast %142 : vector<16x1xf32> to vector<16x32xf32>
    %151 = arith.subf %138, %150 : vector<16x32xf32>
    %cst_45 = arith.constant 9.99999974E-6 : f32
    %152 = vector.broadcast %cst_45 : f32 to vector<16x1xf32>
    %153 = arith.addf %149, %152 : vector<16x1xf32>
    %154 = math.rsqrt %153 : vector<16x1xf32>
    %155 = vector.broadcast %154 : vector<16x1xf32> to vector<16x32xf32>
    %156 = arith.mulf %151, %155 : vector<16x32xf32>
    %157 = vector.broadcast %9 : vector<1x32xf32> to vector<16x32xf32>
    %158 = arith.mulf %156, %157 : vector<16x32xf32>
    %159 = vector.broadcast %10 : vector<1x32xf32> to vector<16x32xf32>
    %160 = arith.addf %158, %159 : vector<16x32xf32>
    %c0_46 = arith.constant 0 : index
    %c0_47 = arith.constant 0 : index
    %c0_48 = arith.constant 0 : index
    %161 = vector.load %arg3[%c0_46, %c0_47, %c0_48] : memref<1x32x128xf32, #tpu.memory_space<vmem>>, vector<1x32x128xf32>
    %162 = vector.shape_cast %161 : vector<1x32x128xf32> to vector<32x128xf32>
    %cst_49 = arith.constant dense<0.000000e+00> : vector<16x128xf32>
    %163 = tpu.matmul %160, %162, %cst_49 {dimension_numbers = #tpu.dot_dimension_numbers<[1], [0], [0], [1], [0, 0, 1, 1], [], []>} : vector<16x32xf32>, vector<32x128xf32>, vector<16x128xf32> -> vector<16x128xf32>
    %164 = vector.broadcast %13 : vector<1x128xf32> to vector<16x128xf32>
    %165 = arith.addf %163, %164 : vector<16x128xf32>
    %cst_50 = arith.constant 1.702000e+00 : f32
    %166 = vector.broadcast %cst_50 : f32 to vector<16x128xf32>
    %167 = arith.mulf %166, %165 : vector<16x128xf32>
    %168 = arith.negf %167 : vector<16x128xf32>
    %169 = math.exp %168 : vector<16x128xf32>
    %cst_51 = arith.constant 1.000000e+00 : f32
    %170 = vector.broadcast %cst_51 : f32 to vector<16x128xf32>
    %171 = arith.addf %170, %169 : vector<16x128xf32>
    %172 = arith.divf %170, %171 : vector<16x128xf32>
    %173 = arith.mulf %165, %172 : vector<16x128xf32>
    %c0_52 = arith.constant 0 : index
    %c0_53 = arith.constant 0 : index
    %c0_54 = arith.constant 0 : index
    %174 = vector.load %arg4[%c0_52, %c0_53, %c0_54] : memref<1x128x32xf32, #tpu.memory_space<vmem>>, vector<1x128x32xf32>
    %175 = vector.shape_cast %174 : vector<1x128x32xf32> to vector<128x32xf32>
    %cst_55 = arith.constant dense<0.000000e+00> : vector<16x32xf32>
    %176 = tpu.matmul %173, %175, %cst_55 {dimension_numbers = #tpu.dot_dimension_numbers<[1], [0], [0], [1], [0, 0, 1, 1], [], []>} : vector<16x128xf32>, vector<128x32xf32>, vector<16x32xf32> -> vector<16x32xf32>
    %177 = vector.broadcast %11 : vector<1x32xf32> to vector<16x32xf32>
    %178 = arith.addf %176, %177 : vector<16x32xf32>
    %179 = arith.addf %138, %178 : vector<16x32xf32>
    %c0_56 = arith.constant 0 : index
    %c0_57 = arith.constant 0 : index
    %180 = vector.load %arg6[%c0_56, %c0_57] : memref<16x32xf32, #tpu.memory_space<vmem>>, vector<16x32xf32>
    tpu.vector_store %arg6[%c0_56, %c0_57], %179 {strides = array<i32>} : memref<16x32xf32, #tpu.memory_space<vmem>>, vector<16x32xf32>,
    return
  }
  func.func @transform_0(%arg0: i32) -> (i32, i32) {
    %c0_i32 = arith.constant 0 : i32
    %c0_i32_0 = arith.constant 0 : i32
    %c0_i32_1 = arith.constant 0 : i32
    return %c0_i32, %c0_i32_0 : i32, i32
  }
  func.func @transform_1(%arg0: i32) -> (i32, i32, i32) {
    %c0_i32 = arith.constant 0 : i32
    %c0_i32_0 = arith.constant 0 : i32
    %c0_i32_1 = arith.constant 0 : i32
    return %arg0, %c0_i32, %c0_i32_0 : i32, i32, i32
  }
  func.func @transform_2(%arg0: i32) -> (i32, i32, i32) {
    %c0_i32 = arith.constant 0 : i32
    %c0_i32_0 = arith.constant 0 : i32
    %c0_i32_1 = arith.constant 0 : i32
    return %arg0, %c0_i32, %c0_i32_0 : i32, i32, i32
  }
  func.func @transform_3(%arg0: i32) -> (i32, i32, i32) {
    %c0_i32 = arith.constant 0 : i32
    %c0_i32_0 = arith.constant 0 : i32
    %c0_i32_1 = arith.constant 0 : i32
    return %arg0, %c0_i32, %c0_i32_0 : i32, i32, i32
  }
  func.func @transform_4(%arg0: i32) -> (i32, i32, i32) {
    %c0_i32 = arith.constant 0 : i32
    %c0_i32_0 = arith.constant 0 : i32
    %c0_i32_1 = arith.constant 0 : i32
    return %arg0, %c0_i32, %c0_i32_0 : i32, i32, i32
  }
  func.func @transform_5(%arg0: i32) -> (i32, i32) {
    %c0_i32 = arith.constant 0 : i32
    %c0_i32_0 = arith.constant 0 : i32
    %c0_i32_1 = arith.constant 0 : i32
    return %c0_i32, %c0_i32_0 : i32, i32
  }
}

</mosaic_0001>

<bundles_post_ra>
// kernel: clip_text_transformer.1
= control target key start
LH: loop header
LB: loop body
LE: loop exit
PB: predicated region body
PF: predicated region fallthrough
CT: control target
= control target key end

     0   :  { %10 = vsyncpa [#allocation3], 0  ;;  %s2464_s18 = smov 0   ;;  %s2739_s0 = inlined_call_operand.vmem [shape: f32[16,32], index: 0, kind: input, shape index: {}]   ;;  %s2740_s1 = inlined_call_operand.vmem [shape: f32[4,32,128], index: 1, kind: input, shape index: {}]   ;;  %s2741_s2 = inlined_call_operand.vmem [shape: f32[4,32,128], index: 2, kind: input, shape index: {}]   ;;  %s2742_s3 = inlined_call_operand.vmem [shape: f32[4,128,32], index: 3, kind: input, shape index: {}]   ;;  %s2743_s4 = inlined_call_operand.vmem [shape: f32[4,8,128], index: 4, kind: input, shape index: {}]   ;;  %s2744_s5 = inlined_call_operand.hbm [shape: f32[16,32], index: 5, kind: output, shape index: {}]  }
   0x1 LB: > { %s2470_s19 = sadd.s32 4294967295, %s2416_s18   ;;  %p1907_p0 = scmp.ge.s32.totalorder %s2416_s18, 1  ;;  %s2416_s18 = sphi %s2464_s18, %s16_s18  }
   0x2   : > { %p212_p1 = scmp.lt.s32.totalorder %s2416_s18, 5 }
   0x4   : > { %p213_p2 = pnand %p1907_p0, %p212_p1 }
   0x5   : > { %p249_p3 = scmp.lt.s32.totalorder (!%p213_p2), %s2470_s19, 3  ;;  %p1915_p4 = scmp.ne.s32.totalorder (!%p213_p2), %s2470_s19, 0 }
   0x6   : > { %216 = sbr.rel (%p213_p2) target bundleno = 3747 (0xea3), region = 40 }
   0xd   : > { %s250_s20 = scalar_select %p249_p3, %s2470_s19, 3 }
   0xe   : > { %271 = sbr.rel (%p1915_p4) target bundleno = 21 (0x15), region = 44  ;;  %v272_v0 = vld [vmem:[%s2739_s0] sm:$0xff] (!%p1915_p4)  ;;  %vm274_vm0 = vcmask (!%p1915_p4), 261120   ;;  %v273_v1 = vld [vmem:[%s2739_s0 + $0x8] sm:$0xff] (!%p1915_p4) }
   0xf   : > { %s1958_s21 = sshll.u32 %s250_s20, 5  ;;  %s1960_s22 = sshll.u32 %s250_s20, 7  ;;  %275 = vst.msk [vmem:[#allocation2] sm:$0xff] (!%p1915_p4), %vm274_vm0, %v272_v0  ;;  %276 = vst.msk [vmem:[#allocation2 + $0x8] sm:$0xff] (!%p1915_p4), %vm274_vm0, %v273_v1 }
  0x10   : > { %s2479_s25 = scalar_lea.vmem %s2740_s1, %s1958_s21  ;;  %s2484_s28 = scalar_lea.vmem %s2741_s2, %s1958_s21 }
  0x11   : > { %s2489_s6 = scalar_lea.vmem %s2742_s3, %s1960_s22  ;;  %s1914_s7 = sshll.u32 %s250_s20, 3 }
  0x12   : > { %s267_s10 = scalar_lea.vmem %s2743_s4, %s1914_s7 }
  0x15 PF: > { %vm303_vm1 = vcmask 261120   ;;  %v284_v6 = vlaneseq  ;;  %v2512_v8 = vld [vmem:[%s267_s10] sm:$0xff]  ;;  %s2418_s15 = smov 96   ;;  %v2528_v22 = vld [vmem:[%s2479_s25 + $0x8] sm:$0xff]  ;;  %v2533_v24 = vld [vmem:[%s2479_s25 + $0x10] sm:$0xff]  ;;  %vm434_vm2 = vcmask 64512  }
  0x16   : > { %v2501_v2 = vld [vmem:[#allocation2] sm:$0xff]  ;;  %v2503_v3 = vld [vmem:[#allocation2 + $0x8] sm:$0xff]  ;;  %v2536_v25 = vld [vmem:[%s2479_s25 + $0x18] sm:$0xff]  ;;  %v2419_v62 = vmov -1e+09   ;;  %vm518_vm10 = vcmask 130048  }
  0x17   : > { %v304_v4 = vsel %vm303_vm1, %v2501_v2, 0.0  ;;  %v307_v5 = vsel %vm303_vm1, %v2503_v3, 0.0  ;;  %v2510_v7 = vshrl.u32 %v284_v6, 7  ;;  %v2525_v21 = vld [vmem:[%s2479_s25] sm:$0xff]  ;;  %v2172_v26 = vpack.c.bf16 %v2536_v25, %v2533_v24  ;;  %vm2560_vm3 = vmpackc.low %vm434_vm2, %vm434_vm2  ;;  %s2420_s16 = smov 88   ;;  %s2421_s17 = smov 120  }
  0x18   : > { %305 = vadd.xlane.f32.xlu0 %v304_v4  ;;  %v2168_v23 = vpack.c.bf16 %v2528_v22, %v2525_v21  ;;  %v288_v55 = vand.u32 127, %v284_v6  ;;  %s2422_s20 = smov 64   ;;  %s2423_s21 = smov 80  }
  0x19   : > { %v333_v9 = vsub.s32 0, %v2510_v7  ;;  %v345_v42 = vsub.s32 2, %v2510_v7  ;;  %v286_v54 = vadd.s32 8, %v2510_v7  ;;  %v289_v60 = vand.u32 1, %v2510_v7  ;;  %s2424_s22 = smov 112   ;;  %s2425_s23 = smov 104  }
  0x1a   : > { %2169 = vmatprep.subr.bf16.mxu1 %v2168_v23  ;;  %v291_v57 = vand.u32 1, %v288_v55  ;;  %v296_v59 = vshra.s32 %v288_v55, 1  ;;  %v294_v61 = vshra.s32 %v2510_v7, 1  ;;  %s2426_s24 = smov 56   ;;  %s2427_s25 = smov 72  }
  0x1b   : > { %v2516_v10 = vrot.slane %v2512_v8, %v333_v9  ;;  %2171 = vmatpush3.bf16.msra.mxu1 %v2168_v23  ;;  %v346_v43 = vrot.slane %v2512_v8, %v345_v42  ;;  %v290_v56 = vand.u32 1, %v286_v54  ;;  %v295_v58 = vshra.s32 %v286_v54, 1  ;;  %s2428_s26 = smov 32   ;;  %s2429_s27 = smov 48  }
  0x1c   : > { %308 = vadd.xlane.f32.xlu0 %v307_v5  ;;  %2173 = vmatprep.subr.bf16.mxu1 %v2172_v26  ;;  %vm292_vm6 = vcmp.eq.s32.totalorder %v289_v60, %v291_v57  ;;  %vm297_vm7 = vcmp.ge.s32.totalorder %v294_v61, %v296_v59  ;;  %s2430_s29 = smov 40   ;;  %p2266_p5 = scmp.eq.s32.totalorder %s2470_s19, 3 }
  0x1d   : > { %vm293_vm4 = vcmp.eq.s32.totalorder %v290_v56, %v291_v57  ;;  %vm298_vm5 = vcmp.ge.s32.totalorder %v295_v58, %v296_v59  ;;  %vm299_vm9 = vmand %vm292_vm6, %vm297_vm7 }
  0x1e   : > { %vm300_vm8 = vmand %vm293_vm4, %vm298_vm5  ;;  %v2576_v0 = vsel %vm299_vm9, 0.0, %v2419_v62 }
  0x1f   : > { %2175 = vmatpush3.bf16.msra.mxu1 %v2172_v26  ;;  %v2574_v63 = vsel %vm300_vm8, 0.0, %v2419_v62 }
  0x32   : > { %338 = vrot.lane.b32.xlu0 %v2516_v10, %s2418_s15 }
  0xa5   : > { %v306_v11 = vpop.xlane.xlu0 %305 }
  0xa6   : > { %v311_v12 = vmul.f32 0.03125, %v306_v11 }
  0xa8   : > { %v313_v13 = vsub.f32 %v2501_v2, %v311_v12 }
  0xa9   : > { %v309_v14 = vpop.xlane.xlu0 %308 }
  0xaa   : > { %v312_v15 = vmul.f32 0.03125, %v309_v14  ;;  %v315_v16 = vmul.f32 %v313_v13, %v313_v13 }
  0xac   : > { %v314_v17 = vsub.f32 %v2503_v3, %v312_v15  ;;  %v317_v18 = vsel %vm303_vm1, %v315_v16, 0.0 }
  0xad   : > { %318 = vadd.xlane.f32.xlu1 %v317_v18  ;;  %v339_v35 = vpop.permute.xlu0 %338 }
  0xae   : > { %v316_v19 = vmul.f32 %v314_v17, %v314_v17 }
  0xb0   : > { %v320_v20 = vsel %vm303_vm1, %v316_v19, 0.0 }
  0xb1   : > { %321 = vadd.xlane.f32.xlu1 %v320_v20 }
 0x13a   : > { %v319_v27 = vpop.xlane.xlu1 %318 }
 0x13b   : > { %v323_v28 = vmul.f32 0.03125, %v319_v27 }
 0x13d   : > { %v325_v29 = vadd.f32 1e-05, %v323_v28 }
 0x13e   : > { %v322_v30 = vpop.xlane.xlu1 %321 }
 0x13f   : > { %2332 = vrsqrt.f32 %v325_v29  ;;  %v324_v31 = vmul.f32 0.03125, %v322_v30 }
 0x141   : > { %v326_v32 = vadd.f32 1e-05, %v324_v31 }
 0x143   : > { %2334 = vrsqrt.f32 %v326_v32 }
 0x149   : > { %v2333_v33 = vpop.eup %2332 }
 0x14a   : > { %v329_v34 = vmul.f32 %v2333_v33, %v313_v13 }
 0x14c   : > { %v335_v36 = vmul.f32 %v2516_v10, %v329_v34 }
 0x14d   : > { %v2335_v37 = vpop.eup %2334 }
 0x14e   : > { %v330_v38 = vmul.f32 %v2335_v37, %v314_v17  ;;  %v341_v39 = vadd.f32 %v339_v35, %v335_v36 }
 0x150   : > { %v336_v40 = vmul.f32 %v2516_v10, %v330_v38  ;;  %2043 = vmatprep.mubr.msk.f32.mxu1 %vm303_vm1, %v341_v39 }
 0x152   : > { %v342_v41 = vadd.f32 %v339_v35, %v336_v40 }
 0x154   : > { %2044 = vmatmul.mubr.msk.f32.vlgmr.msra.gmra.mrb[0].mxu1 %vm303_vm1, %v342_v41 }
 0x227   : > { %v2045_v44 = vpop.f32.mrb[0].mxu1 }
 0x228   : > { %v2546_v45 = vadd.f32 %v2045_v44, %v346_v43  ;;  %v419_v46 = vpop.f32.mrb[1].mxu1 }
 0x229   : > { %v2548_v47 = vadd.f32 %v419_v46, %v346_v43 }
 0x22b   : > { %2050 = vmatprep.mubr.msk.f32.mxu1 %vm434_vm2, %v2548_v47  ;;  %v2554_v48 = vpack.i.bf16 %v2546_v45, %v2548_v47 }
 0x22d   : > { %2293 = vrot.lane.b32.xlu1 %v2554_v48, %s2418_s15 }
 0x29f   : > { %v2294_v49 = vpop.permute.xlu1 %2293 }
 0x2a0   : > { %v2296_v50 = vunpack.i.h.bf16 %v2294_v49  ;;  %v2295_v51 = vunpack.i.l.bf16 %v2294_v49 }
 0x2a2   : > { %v2176_v53 = vpack.c.bf16 %v2296_v50, %v2295_v51 }
 0x2a4   : > { %2178 = vmatprep.subr.msk.bf16.mxu1 %vm2560_vm3, %v2176_v53 }
 0x2a5   : > { %2181 = vmatpush3.bf16.xpose.msk.msra.mxu1 %vm2560_vm3, %v2176_v53 }
 0x2ac   : > { %2051 = vmatmul.mubr.msk.f32.vlgmr.msra.gmra.mrb[2].mxu1 %vm434_vm2, %v2546_v45 }
 0x37f   : > { %v2052_v1 = vpop.f32.mrb[2].mxu1 }
 0x380   : > { %v515_v4 = vadd.f32 %v2052_v1, %v2574_v63  ;;  %v509_v5 = vpop.f32.mrb[3].mxu1 }
 0x381   : > { %v510_v6 = vadd.f32 %v509_v5, %v2576_v0 }
 0x382   : > { %v522_v9 = vsel %vm518_vm10, %v515_v4, -inf }
 0x383   : > { %523 = vmax.xlane.f32.xlu0 %v522_v9  ;;  %v519_v11 = vsel %vm518_vm10, %v510_v6, -inf }
 0x384   : > { %520 = vmax.xlane.f32.xlu1 %v519_v11 }
 0x410   : > { %v524_v12 = vpop.xlane.xlu0 %523 }
 0x411   : > { %v526_v13 = vsub.f32 %v515_v4, %v524_v12  ;;  %v521_v14 = vpop.xlane.xlu1 %520 }
 0x412   : > { %v525_v15 = vsub.f32 %v510_v6, %v521_v14 }
 0x413   : > { %v529_v16 = vmul.f32 1.442695, %v526_v13 }
 0x414   : > { %v527_v17 = vmul.f32 1.442695, %v525_v15 }
 0x415   : > { %2336 = vpow2.f32 %v529_v16 }
 0x416   : > { %2338 = vpow2.f32 %v527_v17 }
 0x41f   : > { %v2337_v18 = vpop.eup %2336 }
 0x420   : > { %v2339_v19 = vpop.eup %2338  ;;  %v534_v20 = vsel %vm518_vm10, %v2337_v18, 0.0 }
 0x421   : > { %535 = vadd.xlane.f32.xlu1 %v534_v20  ;;  %v531_v23 = vsel %vm518_vm10, %v2339_v19, 0.0 }
 0x422   : > { %532 = vadd.xlane.f32.xlu0 %v531_v23 }
 0x432   : > { %2303 = vrot.lane.b32.xlu1 %v2554_v48, %s2420_s16 }
 0x436   : > { %628 = vrot.lane.b32.xlu1 %v2548_v47, %s2421_s17 }
 0x438   : > { %2298 = vrot.lane.b32.xlu0 %v2554_v48, %s2422_s20 }
 0x43a   : > { %630 = vrot.lane.b32.xlu1 %v2546_v45, %s2421_s17 }
 0x4ae   : > { %v536_v26 = vpop.xlane.xlu1 %535 }
 0x4af   : > { %2340 = vrcp.f32 %v536_v26  ;;  %v533_v27 = vpop.xlane.xlu0 %532 }
 0x4b0   : > { %2342 = vrcp.f32 %v533_v27 }
 0x4b2   : > { %v2304_v28 = vpop.permute.xlu1 %2303 }
 0x4b3   : > { %v2299_v29 = vpop.permute.xlu0 %2298  ;;  %v2306_v30 = vunpack.i.h.bf16 %v2304_v28  ;;  %v2305_v31 = vunpack.i.l.bf16 %v2304_v28 }
 0x4b4   : > { %v2301_v32 = vunpack.i.h.bf16 %v2299_v29  ;;  %v2300_v33 = vunpack.i.l.bf16 %v2299_v29 }
 0x4b5   : > { %v2186_v35 = vpack.c.bf16 %v2306_v30, %v2305_v31 }
 0x4b6   : > { %v2182_v34 = vpack.c.bf16 %v2301_v32, %v2300_v33  ;;  %v629_v40 = vpop.permute.xlu1 %628 }
 0x4b8   : > { %2183 = vmatprep.subr.bf16.mxu1 %v2182_v34 }
 0x4b9   : > { %v2341_v36 = vpop.eup %2340  ;;  %2185 = vmatpush3.bf16.msra.mxu1 %v2182_v34 }
 0x4ba   : > { %v2343_v37 = vpop.eup %2342  ;;  %2188 = vmatprep.subr.msk.bf16.mxu1 %vm2560_vm3, %v2186_v35  ;;  %v540_v39 = vmul.f32 %v2341_v36, %v2337_v18  ;;  %v631_v41 = vpop.permute.xlu1 %630 }
 0x4bb   : > { %v539_v38 = vmul.f32 %v2343_v37, %v2339_v19 }
 0x4bd   : > { %2057 = vmatprep.mubr.msk.f32.mxu1 %vm518_vm10, %v539_v38 }
 0x4be   : > { %2058 = vmatmul.mubr.msk.f32.vlgmr.msra.gmra.mrb[4].mxu1 %vm518_vm10, %v540_v39 }
 0x4bf   : > { %2064 = vmatprep.mubr.msk.f32.mxu1 %vm434_vm2, %v629_v40 }
 0x4c2   : > { %2191 = vmatpush3.bf16.xpose.msk.msra.mxu1 %vm2560_vm3, %v2186_v35 }
 0x4c9   : > { %2065 = vmatmul.mubr.msk.f32.vlgmr.msra.gmra.mrb[6].mxu1 %vm434_vm2, %v631_v41 }
 0x591   : > { %v2597_v42 = vpop.f32.mrb[4].mxu1 }
 0x592   : > { %v2599_v43 = vpop.f32.mrb[5].mxu1 }
 0x59c   : > { %v2066_v44 = vpop.f32.mrb[6].mxu1 }
 0x59d   : > { %v716_v46 = vadd.f32 %v2066_v44, %v2574_v63  ;;  %v710_v49 = vpop.f32.mrb[7].mxu1 }
 0x59e   : > { %v711_v50 = vadd.f32 %v710_v49, %v2576_v0 }
 0x59f   : > { %v722_v51 = vsel %vm518_vm10, %v716_v46, -inf }
 0x5a0   : > { %723 = vmax.xlane.f32.xlu1 %v722_v51  ;;  %v719_v53 = vsel %vm518_vm10, %v711_v50, -inf }
 0x5a1   : > { %720 = vmax.xlane.f32.xlu0 %v719_v53 }
 0x5b1   : > { %2313 = vrot.lane.b32.xlu1 %v2554_v48, %s2423_s21 }
 0x5b5   : > { %998 = vrot.lane.b32.xlu1 %v2548_v47, %s2424_s22 }
 0x5b9   : > { %1000 = vrot.lane.b32.xlu1 %v2546_v45, %s2424_s22 }
 0x5bd   : > { %1285 = vrot.lane.b32.xlu1 %v2548_v47, %s2425_s23 }
 0x62d   : > { %v724_v54 = vpop.xlane.xlu1 %723 }
 0x62e   : > { %v726_v55 = vsub.f32 %v716_v46, %v724_v54  ;;  %v721_v56 = vpop.xlane.xlu0 %720 }
 0x62f   : > { %v725_v57 = vsub.f32 %v711_v50, %v721_v56 }
 0x630   : > { %v729_v58 = vmul.f32 1.442695, %v726_v55 }
 0x631   : > { %v727_v59 = vmul.f32 1.442695, %v725_v57  ;;  %v2314_v5 = vpop.permute.xlu1 %2313 }
 0x632   : > { %2344 = vpow2.f32 %v729_v58  ;;  %v2316_v9 = vunpack.i.h.bf16 %v2314_v5  ;;  %v2315_v11 = vunpack.i.l.bf16 %v2314_v5 }
 0x633   : > { %2346 = vpow2.f32 %v727_v59 }
 0x634   : > { %v2196_v15 = vpack.c.bf16 %v2316_v9, %v2315_v11 }
 0x635   : > { %v999_v20 = vpop.permute.xlu1 %998 }
 0x639   : > { %v1001_v28 = vpop.permute.xlu1 %1000 }
 0x63c   : > { %v2345_v60 = vpop.eup %2344 }
 0x63d   : > { %v734_v61 = vsel %vm518_vm10, %v2345_v60, 0.0  ;;  %v2347_v62 = vpop.eup %2346  ;;  %v1286_v29 = vpop.permute.xlu1 %1285 }
 0x63e   : > { %735 = vadd.xlane.f32.xlu0 %v734_v61  ;;  %v731_v1 = vsel %vm518_vm10, %v2347_v62, 0.0 }
 0x642   : > { %732 = vadd.xlane.f32.xlu0 %v731_v1 }
 0x658   : > { %2308 = vrot.lane.b32.xlu0 %v2554_v48, %s2426_s24 }
 0x65c   : > { %2318 = vrot.lane.b32.xlu0 %v2554_v48, %s2427_s25 }
 0x660   : > { %1287 = vrot.lane.b32.xlu0 %v2546_v45, %s2425_s23 }
 0x6cb   : > { %v736_v47 = vpop.xlane.xlu0 %735 }
 0x6cc   : > { %2348 = vrcp.f32 %v736_v47 }
 0x6cf   : > { %v733_v4 = vpop.xlane.xlu0 %732 }
 0x6d0   : > { %2350 = vrcp.f32 %v733_v4 }
 0x6d3   : > { %v2309_v6 = vpop.permute.xlu0 %2308 }
 0x6d4   : > { %v2311_v12 = vunpack.i.h.bf16 %v2309_v6  ;;  %v2310_v13 = vunpack.i.l.bf16 %v2309_v6 }
 0x6d6   : > { %v2192_v14 = vpack.c.bf16 %v2311_v12, %v2310_v13  ;;  %v2349_v16 = vpop.eup %2348 }
 0x6d7   : > { %v2319_v18 = vpop.permute.xlu0 %2318  ;;  %v740_v19 = vmul.f32 %v2349_v16, %v2345_v60 }
 0x6d8   : > { %2193 = vmatprep.subr.bf16.mxu1 %v2192_v14  ;;  %v2321_v23 = vunpack.i.h.bf16 %v2319_v18  ;;  %v2320_v26 = vunpack.i.l.bf16 %v2319_v18 }
 0x6d9   : > { %2195 = vmatpush3.bf16.msra.mxu1 %v2192_v14 }
 0x6da   : > { %v2351_v17 = vpop.eup %2350  ;;  %2198 = vmatprep.subr.msk.bf16.mxu1 %vm2560_vm3, %v2196_v15  ;;  %v2206_v27 = vpack.c.bf16 %v2321_v23, %v2320_v26 }
 0x6db   : > { %v739_v45 = vmul.f32 %v2351_v17, %v2347_v62  ;;  %v1288_v30 = vpop.permute.xlu0 %1287 }
 0x6dd   : > { %2071 = vmatprep.mubr.msk.f32.mxu1 %vm518_vm10, %v739_v45 }
 0x6de   : > { %2072 = vmatmul.mubr.msk.f32.vlgmr.msra.gmra.mrb[8].mxu1 %vm518_vm10, %v740_v19 }
 0x6df   : > { %2088 = vmatprep.mubr.msk.f32.mxu1 %vm434_vm2, %v999_v20 }
 0x6e2   : > { %2201 = vmatpush3.bf16.xpose.msk.msra.mxu1 %vm2560_vm3, %v2196_v15 }
 0x6e3   : > { %2208 = vmatprep.subr.msk.bf16.mxu1 %vm2560_vm3, %v2206_v27 }
 0x6e9   : > { %2089 = vmatmul.mubr.msk.f32.vlgmr.msra.gmra.mrb[10].mxu1 %vm434_vm2, %v1001_v28 }
 0x6ea   : > { %2211 = vmatpush3.bf16.xpose.msk.msra.mxu1 %vm2560_vm3, %v2206_v27  ;;  %2107 = vmatprep.mubr.msk.f32.mxu1 %vm434_vm2, %v1286_v29 }
 0x6f1   : > { %2108 = vmatmul.mubr.msk.f32.vlgmr.msra.gmra.mrb[12].mxu1 %vm434_vm2, %v1288_v30 }
 0x7b1   : > { %v2073_v31 = vpop.f32.mrb[8].mxu1 }
 0x7b2   : > { %v819_v32 = vpop.f32.mrb[9].mxu1 }
 0x7b3   : > { %2076 = vmatprep.mubr.msk.f32.mxu0 %vm434_vm2, %v819_v32 }
 0x7bc   : > { %v2090_v33 = vpop.f32.mrb[10].mxu1 }
 0x7bd   : > { %v1086_v34 = vadd.f32 %v2090_v33, %v2574_v63  ;;  %v1080_v35 = vpop.f32.mrb[11].mxu1 }
 0x7be   : > { %v1081_v36 = vadd.f32 %v1080_v35, %v2576_v0 }
 0x7bf   : > { %v1092_v37 = vsel %vm518_vm10, %v1086_v34, -inf }
 0x7c0   : > { %1093 = vmax.xlane.f32.xlu0 %v1092_v37  ;;  %v1089_v52 = vsel %vm518_vm10, %v1081_v36, -inf }
 0x7c1   : > { %1090 = vmax.xlane.f32.xlu1 %v1089_v52 }
 0x7c4   : > { %v2109_v38 = vpop.f32.mrb[12].mxu1 }
 0x7c5   : > { %v1367_v39 = vpop.f32.mrb[13].mxu1  ;;  %v1373_v61 = vadd.f32 %v2109_v38, %v2574_v63 }
 0x7c6   : > { %v1368_v40 = vadd.f32 %v1367_v39, %v2576_v0 }
 0x7c8   : > { %v1376_v41 = vsel %vm518_vm10, %v1368_v40, -inf }
 0x7d2   : > { %829 = vrot.lane.b32.xlu1 %v2528_v22, %s2428_s26 }
 0x7d6   : > { %2323 = vrot.lane.b32.xlu1 %v2554_v48, %s2429_s27 }
 0x7fa   : > { %1377 = vmax.xlane.f32.xlu1 %v1376_v41 }
 0x84d   : > { %v1094_v44 = vpop.xlane.xlu0 %1093 }
 0x84e   : > { %v1096_v46 = vsub.f32 %v1086_v34, %v1094_v44  ;;  %v1091_v49 = vpop.xlane.xlu1 %1090 }
 0x84f   : > { %v1095_v50 = vsub.f32 %v1081_v36, %v1091_v49 }
 0x850   : > { %v1099_v51 = vmul.f32 1.442695, %v1096_v46 }
 0x851   : > { %v1097_v53 = vmul.f32 1.442695, %v1095_v50 }
 0x852   : > { %2352 = vpow2.f32 %v1099_v51  ;;  %v830_v54 = vpop.permute.xlu1 %829 }
 0x853   : > { %2074 = vmatprep.subr.mxu0 %v830_v54  ;;  %2354 = vpow2.f32 %v1097_v53 }
 0x854   : > { %2075 = vmatpush3.msra.mxu0 %v830_v54 }
 0x855   : > { %2077 = vmatmul.mubr.msk.f32.vlgmr.msra.gmra.mrb[0].mxu0 %vm434_vm2, %v2073_v31 }
 0x856   : > { %2081 = vmatprep.mubr.msk.f32.mxu0 %vm434_vm2, %v2599_v43  ;;  %v2324_v57 = vpop.permute.xlu1 %2323  ;;  %v1379_v43 = vsel %vm518_vm10, %v1373_v61, -inf }
 0x857   : > { %v2326_v4 = vunpack.i.h.bf16 %v2324_v57  ;;  %v2325_v5 = vunpack.i.l.bf16 %v2324_v57 }
 0x859   : > { %v2202_v9 = vpack.c.bf16 %v2326_v4, %v2325_v5 }
 0x85c   : > { %v2353_v22 = vpop.eup %2352 }
 0x85d   : > { %v1104_v0 = vsel %vm518_vm10, %v2353_v22, 0.0  ;;  %v2355_v55 = vpop.eup %2354 }
 0x85e   : > { %1105 = vadd.xlane.f32.xlu0 %v1104_v0  ;;  %v1101_v56 = vsel %vm518_vm10, %v2355_v55, 0.0  ;;  %v1612_v0 = vsub.s32 1, %v2510_v7 }
 0x862   : > { %1102 = vadd.xlane.f32.xlu0 %v1101_v56  ;;  %v1617_v56 = vld [vmem:[%s2484_s28 + $0x8] sm:$0xff] }
 0x878   : > { %914 = vrot.lane.b32.xlu0 %v2525_v21, %s2428_s26 }
 0x887   : > { %v1378_v58 = vpop.xlane.xlu1 %1377 }
 0x888   : > { %v1382_v59 = vsub.f32 %v1368_v40, %v1378_v58  ;;  %v1613_v58 = vrot.slane %v2512_v8, %v1612_v0 }
 0x88a   : > { %v1384_v60 = vmul.f32 1.442695, %v1382_v59  ;;  %v1618_v59 = vld [vmem:[%s2484_s28 + $0x10] sm:$0xff] }
 0x88c   : > { %2356 = vpow2.f32 %v1384_v60  ;;  %v1619_v60 = vld [vmem:[%s2484_s28 + $0x18] sm:$0xff] }
 0x896   : > { %v2357_v62 = vpop.eup %2356 }
 0x897   : > { %1380 = vmax.xlane.f32.xlu0 %v1379_v43  ;;  %v1388_v1 = vsel %vm518_vm10, %v2357_v62, 0.0 }
 0x89b   : > { %1389 = vadd.xlane.f32.xlu0 %v1388_v1 }
 0x8b1   : > { %1199 = vrot.lane.b32.xlu0 %v2533_v24, %s2428_s26 }
 0x8eb   : > { %v1106_v47 = vpop.xlane.xlu0 %1105 }
 0x8ec   : > { %2358 = vrcp.f32 %v1106_v47 }
 0x8ef   : > { %v1103_v21 = vpop.xlane.xlu0 %1102 }
 0x8f0   : > { %2360 = vrcp.f32 %v1103_v21 }
 0x8f3   : > { %v915_v6 = vpop.permute.xlu0 %914 }
 0x8f4   : > { %2079 = vmatprep.subr.mxu0 %v915_v6 }
 0x8f5   : > { %2080 = vmatpush3.msra.mxu0 %v915_v6 }
 0x8f6   : > { %2082 = vmatmul.mubr.msk.f32.vlgmr.msra.gmra.mrb[0].mxu0 %vm434_vm2, %v2597_v42  ;;  %2203 = vmatprep.subr.bf16.mxu0 %v2202_v9  ;;  %v2359_v63 = vpop.eup %2358 }
 0x8f7   : > { %2205 = vmatpush3.bf16.msra.mxu0 %v2202_v9  ;;  %v1110_v13 = vmul.f32 %v2359_v63, %v2353_v22 }
 0x8fa   : > { %v2361_v11 = vpop.eup %2360 }
 0x8fb   : > { %v1109_v12 = vmul.f32 %v2361_v11, %v2355_v55  ;;  %v1616_v55 = vld [vmem:[%s2484_s28] sm:$0xff]  ;;  %s2431_s28 = smov [#allocation2]  }
 0x8fc   : > { %v2216_v57 = vpack.c.bf16 %v1617_v56, %v1616_v55  ;;  %s1826_s30 = sshll.u32 %s2431_s28, 4  ;;  %s1827_s30 = int_to_ptr.vmem [resolvable:$true] %s1826_s30 }
 0x8fd   : > { %2095 = vmatprep.mubr.msk.f32.mxu0 %vm518_vm10, %v1109_v12  ;;  %p2387_p9 = scmp.lt.s32.totalorder %s1827_s30, %s1827_s30 }
 0x8fe   : > { %2096 = vmatmul.mubr.msk.f32.vlgmr.msra.gmra.mrb[2].mxu0 %vm518_vm10, %v1110_v13  ;;  %2217 = vmatprep.subr.bf16.mxu1 %v2216_v57 }
 0x8ff   : > { %2219 = vmatpush3.bf16.msra.mxu1 %v2216_v57 }
 0x924   : > { %v1381_v24 = vpop.xlane.xlu0 %1380 }
 0x925   : > { %v1383_v14 = vsub.f32 %v1373_v61, %v1381_v24  ;;  %v2220_v61 = vpack.c.bf16 %v1619_v60, %v1618_v59 }
 0x927   : > { %v1386_v15 = vmul.f32 1.442695, %v1383_v14  ;;  %2221 = vmatprep.subr.bf16.mxu1 %v2220_v61  ;;  %v1721_v14 = vld [vmem:[%s2489_s6] sm:$0xff] }
 0x928   : > { %v1390_v18 = vpop.xlane.xlu0 %1389  ;;  %2223 = vmatpush3.bf16.msra.mxu1 %v2220_v61 }
 0x929   : > { %2362 = vpow2.f32 %v1386_v15  ;;  %v1722_v15 = vld [vmem:[%s2489_s6 + $0x8] sm:$0xff] }
 0x92a   : > { %2364 = vrcp.f32 %v1390_v18  ;;  %v1724_v18 = vld [vmem:[%s2489_s6 + $0x18] sm:$0xff] }
 0x92c   : > { %v1200_v42 = vpop.permute.xlu0 %1199 }
 0x92d   : > { %2098 = vmatprep.subr.mxu0 %v1200_v42 }
 0x92e   : > { %2099 = vmatpush3.msra.mxu0 %v1200_v42 }
 0x933   : > { %v2363_v16 = vpop.eup %2362 }
 0x934   : > { %v1391_v17 = vsel %vm518_vm10, %v2363_v16, 0.0  ;;  %v2365_v27 = vpop.eup %2364 }
 0x935   : > { %1392 = vadd.xlane.f32.xlu1 %v1391_v17  ;;  %v1723_v17 = vld [vmem:[%s2489_s6 + $0x10] sm:$0xff] }
 0x936   : > { %v2228_v42 = vpack.c.bf16 %v1724_v18, %v1723_v17 }
 0x946   : > { %2328 = vrot.lane.b32.xlu1 %v2554_v48, %s2430_s29 }
 0x94a   : > { %1486 = vrot.lane.b32.xlu1 %v2536_v25, %s2428_s26  ;;  %v1396_v25 = vmul.f32 %v2365_v27, %v2357_v62 }
 0x94e   : > { %1574 = vrot.lane.b32.xlu1 %v2516_v10, %s2422_s20 }
 0x9c2   : > { %v1393_v45 = vpop.xlane.xlu1 %1392 }
 0x9c3   : > { %2366 = vrcp.f32 %v1393_v45  ;;  %v1725_v45 = vld [vmem:[%s2489_s6 + $0x20] sm:$0xff] }
 0x9c6   : > { %v2329_v19 = vpop.permute.xlu1 %2328 }
 0x9c7   : > { %v2331_v20 = vunpack.i.h.bf16 %v2329_v19  ;;  %v2330_v23 = vunpack.i.l.bf16 %v2329_v19  ;;  %v1726_v19 = vld [vmem:[%s2489_s6 + $0x28] sm:$0xff] }
 0x9c9   : > { %v2212_v26 = vpack.c.bf16 %v2331_v20, %v2330_v23  ;;  %v2232_v20 = vpack.c.bf16 %v1726_v19, %v1725_v45  ;;  %v1727_v23 = vld [vmem:[%s2489_s6 + $0x30] sm:$0xff] }
 0x9ca   : > { %v1487_v30 = vpop.permute.xlu1 %1486 }
 0x9cb   : > { %2213 = vmatprep.subr.bf16.mxu0 %v2212_v26 }
 0x9cd   : > { %v2367_v29 = vpop.eup %2366 }
 0x9ce   : > { %v1397_v31 = vmul.f32 %v2367_v29, %v2363_v16  ;;  %v1575_v35 = vpop.permute.xlu1 %1574  ;;  %v2224_v16 = vpack.c.bf16 %v1722_v15, %v1721_v14 }
 0x9d1   : > { %v2097_v28 = vpop.f32.mrb[2].mxu0 }
 0x9d2   : > { %v1189_v48 = vpop.f32.mrb[3].mxu0 }
 0x9d3   : > { %2100 = vmatprep.mubr.msk.f32.mxu0 %vm434_vm2, %v1189_v48  ;;  %v1730_v48 = vld [vmem:[%s2489_s6 + $0x48] sm:$0xff] }
 0x9d4   : > { %2101 = vmatmul.mubr.msk.f32.vlgmr.msra.gmra.mrb[0].mxu0 %vm434_vm2, %v2097_v28  ;;  %v1729_v28 = vld [vmem:[%s2489_s6 + $0x40] sm:$0xff] }
 0x9d5   : > { %2215 = vmatpush3.bf16.msra.mxu0 %v2212_v26  ;;  %2114 = vmatprep.mubr.msk.f32.mxu0 %vm518_vm10, %v1396_v25  ;;  %v1728_v26 = vld [vmem:[%s2489_s6 + $0x38] sm:$0xff]  ;;  %v2240_v29 = vpack.c.bf16 %v1730_v48, %v1729_v28  ;;  %v1731_v25 = vld [vmem:[%s2489_s6 + $0x50] sm:$0xff] }
 0x9d6   : > { %2117 = vmatprep.subr.mxu0 %v1487_v30  ;;  %v2236_v27 = vpack.c.bf16 %v1728_v26, %v1727_v23 }
 0x9d8   : > { %2115 = vmatmul.mubr.msk.f32.vlgmr.msra.gmra.mrb[4].mxu0 %vm518_vm10, %v1397_v31 }
 0x9d9   : > { %2118 = vmatpush3.msra.mxu0 %v1487_v30  ;;  %v1732_v30 = vld [vmem:[%s2489_s6 + $0x58] sm:$0xff] }
 0x9da   : > { %2225 = vmatprep.subr.bf16.mxu0 %v2224_v16  ;;  %v2244_v31 = vpack.c.bf16 %v1732_v30, %v1731_v25 }
 0xaab   : > { %v2116_v32 = vpop.f32.mrb[4].mxu0 }
 0xaac   : > { %v1476_v33 = vpop.f32.mrb[5].mxu0 }
 0xaad   : > { %2119 = vmatprep.mubr.msk.f32.mxu0 %vm434_vm2, %v1476_v33  ;;  %v1734_v33 = vld [vmem:[%s2489_s6 + $0x68] sm:$0xff] }
 0xaae   : > { %2120 = vmatmul.mubr.msk.f32.vlgmr.msra.gmra.mrb[0].mxu0 %vm434_vm2, %v2116_v32  ;;  %v1733_v32 = vld [vmem:[%s2489_s6 + $0x60] sm:$0xff] }
 0xaaf   : > { %2227 = vmatpush3.bf16.msra.mxu0 %v2224_v16 }
 0xab0   : > { %2229 = vmatprep.subr.bf16.mxu0 %v2228_v42 }
 0xab3   : > { %2231 = vmatpush3.bf16.msra.mxu0 %v2228_v42 }
 0xab4   : > { %2233 = vmatprep.subr.bf16.mxu0 %v2232_v20 }
 0xab7   : > { %2235 = vmatpush3.bf16.msra.mxu0 %v2232_v20 }
 0xab8   : > { %2237 = vmatprep.subr.bf16.mxu0 %v2236_v27 }
 0xabb   : > { %2239 = vmatpush3.bf16.msra.mxu0 %v2236_v27 }
 0xabc   : > { %2241 = vmatprep.subr.bf16.mxu0 %v2240_v29 }
 0xabf   : > { %2243 = vmatpush3.bf16.msra.mxu0 %v2240_v29 }
 0xac0   : > { %2245 = vmatprep.subr.bf16.mxu0 %v2244_v31 }
 0xac3   : > { %2247 = vmatpush3.bf16.msra.mxu0 %v2244_v31 }
 0xb81   : > { %v2121_v34 = vpop.f32.mrb[0].mxu0 }
 0xb82   : > { %v1573_v36 = vadd.f32 %v2121_v34, %v2503_v3  ;;  %v1561_v37 = vpop.f32.mrb[1].mxu0  ;;  %v2248_v34 = vpack.c.bf16 %v1734_v33, %v1733_v32 }
 0xb83   : > { %v1572_v52 = vadd.f32 %v1561_v37, %v2501_v2 }
 0xb84   : > { %v2668_v38 = vadd.f32 %v1575_v35, %v1573_v36  ;;  %2249 = vmatprep.subr.bf16.mxu0 %v2248_v34  ;;  %v1736_v36 = vld [vmem:[%s2489_s6 + $0x78] sm:$0xff] }
 0xb85   : > { %v2670_v39 = vadd.f32 %v1575_v35, %v1572_v52  ;;  %2251 = vmatpush3.bf16.msra.mxu0 %v2248_v34  ;;  %v1735_v35 = vld [vmem:[%s2489_s6 + $0x70] sm:$0xff]  ;;  %v1622_v52 = vsub.s32 3, %v2510_v7  ;;  %s2380_s6 = scalar_lea.vmem %s1827_s30, 256 }
 0xb86   : > { %v1582_v40 = vsel %vm303_vm1, %v2668_v38, 0.0  ;;  %v2252_v37 = vpack.c.bf16 %v1736_v36, %v1735_v35  ;;  %p2381_p6 = scmp.ne.s32.totalorder %s1827_s30, %s2380_s6  ;;  %p2388_p10 = scmp.lt.s32.totalorder %s2380_s6, %s2380_s6 }
 0xb87   : > { %1583 = vadd.xlane.f32.xlu1 %v1582_v40  ;;  %v1579_v41 = vsel %vm303_vm1, %v2670_v39, 0.0  ;;  %v1623_v40 = vrot.slane %v2512_v8, %v1622_v52 }
 0xb88   : > { %1580 = vadd.xlane.f32.xlu0 %v1579_v41  ;;  %2253 = vmatprep.subr.bf16.mxu0 %v2252_v37  ;;  %p2382_p7 = pnand %p2381_p6, %p2266_p5  ;;  %p2389_p11 = por %p2388_p10, %p2387_p9 }
 0xb89   : > { %2255 = vmatpush3.bf16.msra.mxu0 %v2252_v37 }
 0xb8a   : > { %p2383_p8 = pneg %p2382_p7 }
 0xb8c   : > { %p2390_p12 = pnand %p2389_p11, %p2383_p8 }
 0xb98   : > { %1738 = vrot.lane.b32.xlu1 %v1613_v58, %s2418_s15 }
 0xc14   : > { %v1584_v44 = vpop.xlane.xlu1 %1583 }
 0xc15   : > { %v1586_v46 = vmul.f32 0.03125, %v1584_v44  ;;  %v1581_v3 = vpop.xlane.xlu0 %1580 }
 0xc16   : > { %v1585_v49 = vmul.f32 0.03125, %v1581_v3 }
 0xc17   : > { %v1588_v2 = vsub.f32 %v2668_v38, %v1586_v46 }
 0xc18   : > { %v1587_v50 = vsub.f32 %v2670_v39, %v1585_v49  ;;  %v1739_v57 = vpop.permute.xlu1 %1738 }
 0xc19   : > { %v1590_v51 = vmul.f32 %v1588_v2, %v1588_v2 }
 0xc1a   : > { %v1589_v54 = vmul.f32 %v1587_v50, %v1587_v50 }
 0xc1b   : > { %v1594_v53 = vsel %vm303_vm1, %v1590_v51, 0.0 }
 0xc1c   : > { %1595 = vadd.xlane.f32.xlu0 %v1594_v53  ;;  %v1591_v22 = vsel %vm303_vm1, %v1589_v54, 0.0 }
 0xc20   : > { %1592 = vadd.xlane.f32.xlu0 %v1591_v22 }
 0xc36   : > { %1605 = vrot.lane.b32.xlu0 %v2516_v10, %s2428_s26 }
 0xca9   : > { %v1596_v43 = vpop.xlane.xlu0 %1595 }
 0xcaa   : > { %v1598_v62 = vmul.f32 0.03125, %v1596_v43 }
 0xcac   : > { %v1600_v1 = vadd.f32 1e-05, %v1598_v62 }
 0xcad   : > { %v1593_v10 = vpop.xlane.xlu0 %1592 }
 0xcae   : > { %2368 = vrsqrt.f32 %v1600_v1  ;;  %v1597_v47 = vmul.f32 0.03125, %v1593_v10 }
 0xcb0   : > { %v1599_v21 = vadd.f32 1e-05, %v1597_v47 }
 0xcb1   : > { %v1606_v6 = vpop.permute.xlu0 %1605 }
 0xcb2   : > { %2370 = vrsqrt.f32 %v1599_v21 }
 0xcb8   : > { %v2369_v4 = vpop.eup %2368 }
 0xcb9   : > { %v1604_v5 = vmul.f32 %v2369_v4, %v1588_v2 }
 0xcbb   : > { %v1609_v11 = vmul.f32 %v1606_v6, %v1604_v5 }
 0xcbc   : > { %v2371_v9 = vpop.eup %2370 }
 0xcbd   : > { %v1603_v63 = vmul.f32 %v2371_v9, %v1587_v50  ;;  %v1615_v24 = vadd.f32 %v1613_v58, %v1609_v11 }
 0xcbf   : > { %v1608_v12 = vmul.f32 %v1606_v6, %v1603_v63 }
 0xcc1   : > { %v1614_v13 = vadd.f32 %v1613_v58, %v1608_v12 }
 0xcc3   : > { %2130 = vmatprep.mubr.msk.f32.mxu1 %vm303_vm1, %v1614_v13 }
 0xcc4   : > { %2131 = vmatmul.mubr.msk.f32.vlgmr.msra.gmra.mrb[14].mxu1 %vm303_vm1, %v1615_v24 }
 0xd97   : > { %v2132_v41 = vpop.f32.mrb[14].mxu1 }
 0xd98   : > { %v1702_v44 = vadd.f32 %v2132_v41, %v1623_v40  ;;  %v1696_v46 = vpop.f32.mrb[15].mxu1 }
 0xd99   : > { %v1697_v3 = vadd.f32 %v1696_v46, %v1623_v40 }
 0xd9a   : > { %v1953_v49 = vmul.f32 -1.702, %v1702_v44 }
 0xd9b   : > { %v1952_v2 = vmul.f32 -1.702, %v1697_v3 }
 0xd9c   : > { %v1711_v50 = vmul.f32 1.442695, %v1953_v49 }
 0xd9d   : > { %v1709_v51 = vmul.f32 1.442695, %v1952_v2 }
 0xd9e   : > { %2372 = vpow2.f32 %v1711_v50 }
 0xd9f   : > { %2374 = vpow2.f32 %v1709_v51 }
 0xda8   : > { %v2373_v53 = vpop.eup %2372 }
 0xda9   : > { %v2375_v54 = vpop.eup %2374  ;;  %v1714_v22 = vadd.f32 1.0, %v2373_v53 }
 0xdaa   : > { %v1713_v0 = vadd.f32 1.0, %v2375_v54 }
 0xdab   : > { %2376 = vrcp.f32 %v1714_v22 }
 0xdac   : > { %2378 = vrcp.f32 %v1713_v0 }
 0xdb5   : > { %v2377_v7 = vpop.eup %2376 }
 0xdb6   : > { %v2379_v55 = vpop.eup %2378  ;;  %v1720_v56 = vmul.f32 %v2377_v7, %v1702_v44 }
 0xdb7   : > { %v1719_v8 = vmul.f32 %v2379_v55, %v1697_v3 }
 0xdb9   : > { %2165 = vmatprep.mubr.f32.mxu0 %v1719_v8 }
 0xdba   : > { %2166 = vmatmul.mubr.f32.vlgmr.msra.gmra.mrb[6].mxu0 %v1720_v56 }
 0xe8d   : > { %v2167_v58 = vpop.f32.mrb[6].mxu0 }
 0xe8e   : > { %v1813_v59 = vadd.f32 %v2167_v58, %v1739_v57  ;;  %v1807_v60 = vpop.f32.mrb[7].mxu0 }
 0xe8f   : > { %v1808_v61 = vadd.f32 %v1807_v60, %v1739_v57 }
 0xe90   : > { %v1817_v43 = vadd.f32 %v1813_v59, %v2668_v38 }
 0xe91   : > { %v1816_v62 = vadd.f32 %v1808_v61, %v2670_v39 }
 0xe92   : > { %1819 = vst.msk [vmem:[#allocation2 + $0x8] sm:$0xff] %vm303_vm1, %v1817_v43 }
 0xe93   : > { %1818 = vst.msk [vmem:[#allocation2] sm:$0xff] %vm303_vm1, %v1816_v62 }
 0xe94   : > { %2393 = shalt.err (!%p2390_p12)
}
 0xe95   : > { %s2394_s9 = scalar_lea.hbm %s2744_s5, 256 }
 0xe96   : > { %p2395_p13 = scmp.ne.s32.totalorder %s2744_s5, %s2394_s9  ;;  %p2400_p2 = scmp.lt.u32.totalorder %s2394_s9, %s2744_s5 }
 0xe98   : > { %p2396_p0 = pnand %p2395_p13, %p2266_p5 }
 0xe9a   : > { %p2397_p1 = pneg %p2396_p0 }
 0xe9c   : > { %p2402_p3 = pnand %p2400_p2, %p2397_p1 }
 0xe9e   : > { %2405 = shalt.err (!%p2402_p3)
}
 0xe9f   : > { %s2432_s14 = smov 128   ;;  %s2433_s15 = smov 8  }
 0xea0   : > { %2263 = dma.vmem_to_hbm [thread:$0]  (%p2266_p5), %s1827_s30, 256, %s2744_s5, [#allocation3], %s2432_s14, %s2432_s14, %s2433_s15  }
 0xea1   : > { %2411 = dma.done.wait (%p2266_p5), [#allocation3], 256  }
 0xea2   : > { %2413 = vsyncadd (%p2266_p5), [#allocation3], 4294967040 }
 0xea3 PF: > { %s16_s18 = sadd.s32 1, %s2416_s18  }
 0xea4   : > { %p13_p4 = scmp.ge.s32.totalorder %s16_s18, 6  }
 0xea6   :  { %15 = sbr.rel (!%p13_p4) target bundleno = 1 (0x1), region = 80 }
 0xead   :  { %1842 = vsyncpa [#allocation3], 1 }
 0xeae   :  { %1844 = vsyncpa [#allocation3 + $0x1], 1 }

</bundles_post_ra>
